<compile_context>
chip_gen: v7x
topology: tpu7x:2x2x1
jax: 0.10.0
libtpu: 0.0.40
codegen_flags: <defaults>
</compile_context>

<pallas_src>
import functools

import jax
import jax.numpy as jnp
from jax import lax
from jax.experimental import pallas as pl
from jax.experimental.pallas import tpu as pltpu

LN_EPS = 1e-5
_SQRT_HALF = 0.7071067811865476


def _round_up(n: int, m: int) -> int:
    return ((n + m - 1) // m) * m


def _cdiv(a: int, b: int) -> int:
    return -(-a // b)


def _sublane(dtype) -> int:
    itemsize = jnp.dtype(dtype).itemsize
    if itemsize == 2:
        return 16
    if itemsize == 1:
        return 32
    return 8


def _vmem_capacity_bytes() -> int:
    try:
        return int(pltpu.get_tpu_info().vmem_capacity_bytes)
    except Exception:
        return 64 * 1024 * 1024  # conservative: v7x per-TensorCore VMEM


def _need_bytes(tm: int, th: int, D: int, nk: int, x_bytes: int, w_bytes: int) -> int:
    """Rough VMEM requirement for a (tm, th) tiling choice."""
    w_bufs = 1 if nk == 1 else 2                    # resident+single vs streamed+double
    weights = w_bufs * 2 * D * th * w_bytes         # W1^T tile + W2^T tile
    vectors = 2 * 4 * (D + th) * 4                  # gamma/beta/b1/b2 blocks (generous)
    io = 4 * tm * D * x_bytes                       # x + out, double-buffered
    scratch = tm * D * (w_bytes + 4)                # normed + f32 accumulator
    temps = 4 * tm * max(D, th) * 4                 # ~3-4 live f32 compiler temporaries
    return weights + vectors + io + scratch + temps


def _select_tiling(N: int, D: int, x_dtype, w_dtype, tm_target: int, budget: int):
    """Pick (tm, th, nk) so the working set fits the VMEM budget."""
    sub = _sublane(x_dtype)
    xb = jnp.dtype(x_dtype).itemsize
    wb = jnp.dtype(w_dtype).itemsize

    # Row tile: as large as requested, but (a) no larger than the row count and
    # (b) small enough that the row grid has >= 2 steps (v7x has 2 TensorCores;
    # a single "parallel" step would leave one idle).
    tm = _round_up(max(sub, min(tm_target, N)), sub)
    if N > sub:
        tm = min(tm, _round_up(_cdiv(N, 2), sub))
    tm = max(tm, sub)

    def tm_candidates(start):
        t, out = start, []
        while t >= sub:
            out.append(t)
            if t == sub:
                break
            t = max(sub, _round_up(t // 2, sub))
        return out

    # 1) Prefer keeping both full weight matrices resident (single-buffered):
    #    weights are then DMA'd from HBM exactly once for the whole kernel.
    for t in tm_candidates(tm):
        if _need_bytes(t, D, D, 1, xb, wb) <= budget:
            return t, D, 1

    # 2) Otherwise stream (D, th) / (th, D) weight tiles over a second grid
    #    axis.  th must be a multiple of 128 that divides D exactly (a partial
    #    hidden tile would feed garbage into the accumulator).
    ths = sorted((t for t in range(128, D, 128) if D % t == 0), reverse=True)
    for t in tm_candidates(tm):
        for th in ths:
            if _need_bytes(t, th, D, D // th, xb, wb) <= budget:
                return t, th, D // th

    # 3) Last resort: smallest expressible tiles (may spill for extreme D).
    # TODO(synk): D that is not a multiple of 128 and does not fit VMEM would
    # need masked partial hidden tiles or host-side D padding.
    if ths:
        return sub, ths[-1], D // ths[-1]
    return sub, D, 1


def _resblock_kernel(x_ref, gamma_ref, beta_ref, w1t_ref, b1_ref, w2t_ref, b2_ref,
                     o_ref, normed_ref, acc_ref, *, approx_gelu: bool):
    k = pl.program_id(1)
    nk = pl.num_programs(1)

    # ---- k == 0: LayerNorm for this row tile; init the f32 accumulator ----
    @pl.when(k == 0)
    def _():
        xf = x_ref[...].astype(jnp.float32)
        mean = jnp.mean(xf, axis=-1, keepdims=True)
        xc = xf - mean
        var = jnp.mean(xc * xc, axis=-1, keepdims=True)
        normed = (xc * lax.rsqrt(var + LN_EPS)
                  * gamma_ref[...].astype(jnp.float32)
                  + beta_ref[...].astype(jnp.float32))
        normed_ref[...] = normed.astype(normed_ref.dtype)   # MXU-feed dtype
        acc_ref[...] = jnp.zeros_like(acc_ref)

    # ---- hidden-dim tile: Linear1 slice -> +b1 -> GELU -> accumulate Linear2 ----
    h = jnp.dot(normed_ref[...], w1t_ref[...], preferred_element_type=jnp.float32)
    h = h + b1_ref[...].astype(jnp.float32)
    if approx_gelu:
        # tanh approximation (EUP path) — for VALU-bound small-D configs.
        h = 0.5 * h * (1.0 + jnp.tanh(0.7978845608028654 * (h + 0.044715 * h * h * h)))
    else:
        # Exact erf GELU — matches torch nn.GELU default.
        h = 0.5 * h * (1.0 + lax.erf(h * jnp.float32(_SQRT_HALF)))
    acc_ref[...] += jnp.dot(h.astype(w2t_ref.dtype), w2t_ref[...],
                            preferred_element_type=jnp.float32)

    # ---- last k: bias2 + residual (re-read x so its f32 copy is not live
    #      across the matmuls) ----
    @pl.when(k == nk - 1)
    def _():
        y = acc_ref[...] + b2_ref[...].astype(jnp.float32)
        o_ref[...] = (x_ref[...].astype(jnp.float32) + y).astype(o_ref.dtype)


def simple_res_block(x, gamma, beta, w1, b1, w2, b2, *, tm=512,
                     hidden_tile=None, cast_weights_to_bf16=False,
                     approx_gelu=False, vmem_limit_bytes=None):
    """x: (..., D). LayerNorm + Linear(D,D) + GELU + Linear(D,D) + residual.

    w1, w2 are torch nn.Linear layout (out_features, in_features); transposed
    once here (outside the kernel) to (in, out).  `tm` is the desired row tile
    (upper bound).  `hidden_tile` forces the hidden-dim tile width (must be a
    multiple of 128 dividing D, or D itself).
    """
    orig_shape = x.shape
    D = orig_shape[-1]
    x2 = x.reshape(-1, D)
    N = x2.shape[0]

    # One-time host-side transpose to (in, out); optional bf16 cast for native
    # MXU throughput (f32 accumulation is kept in the kernel).
    w1t = jnp.transpose(w1)
    w2t = jnp.transpose(w2)
    if cast_weights_to_bf16:
        w1t = w1t.astype(jnp.bfloat16)
        w2t = w2t.astype(jnp.bfloat16)
    w_dtype = w1t.dtype

    gamma2 = gamma.reshape(1, D)
    beta2 = beta.reshape(1, D)
    b1_2 = b1.reshape(1, D)
    b2_2 = b2.reshape(1, D)

    # Generation-aware VMEM budgeting (v7x: 64 MiB/TC, v5e/v6e: 128 MiB).
    cap = _vmem_capacity_bytes()
    budget = int(cap * 0.70)
    tm_sel, th, nk = _select_tiling(N, D, x2.dtype, w_dtype, tm, budget)
    if hidden_tile is not None and D % hidden_tile == 0 and \
            (hidden_tile == D or hidden_tile % 128 == 0):
        th = hidden_tile
        nk = D // th

    need = _need_bytes(tm_sel, th, D, nk,
                       jnp.dtype(x2.dtype).itemsize, jnp.dtype(w_dtype).itemsize)
    if vmem_limit_bytes is None:
        vmem_limit_bytes = min(int(cap * 0.85), max(need + (8 << 20), 32 << 20))

    nrows = _cdiv(N, tm_sel)
    kernel = functools.partial(_resblock_kernel, approx_gelu=approx_gelu)

    def build(single_buf):
        def inv(shape):  # grid-invariant operands
            if single_buf:
                return pl.BlockSpec(shape, lambda i, k: (0, 0),
                                    pipeline_mode=pl.Buffered(1))
            return pl.BlockSpec(shape, lambda i, k: (0, 0))

        def wspec(shape, imap):  # weights: resident (single-buffered) or streamed
            if single_buf and nk == 1:
                return pl.BlockSpec(shape, imap, pipeline_mode=pl.Buffered(1))
            return pl.BlockSpec(shape, imap)

        return pl.pallas_call(
            kernel,
            out_shape=jax.ShapeDtypeStruct((N, D), x.dtype),
            grid_spec=pltpu.PrefetchScalarGridSpec(
                num_scalar_prefetch=0,
                grid=(nrows, nk),
                in_specs=[
                    pl.BlockSpec((tm_sel, D), lambda i, k: (i, 0)),  # x (resident over k)
                    inv((1, D)),                                     # gamma
                    inv((1, D)),                                     # beta
                    wspec((D, th), lambda i, k: (0, k)),             # W1^T tile (in, hid)
                    wspec((1, th), lambda i, k: (0, k)),             # b1 tile
                    wspec((th, D), lambda i, k: (k, 0)),             # W2^T tile (hid, out)
                    inv((1, D)),                                     # b2
                ],
                out_specs=pl.BlockSpec((tm_sel, D), lambda i, k: (i, 0)),
                scratch_shapes=[
                    pltpu.VMEM((tm_sel, D), w_dtype),      # LayerNorm output (MXU feed)
                    pltpu.VMEM((tm_sel, D), jnp.float32),  # f32 accumulator
                ],
            ),
            compiler_params=pltpu.CompilerParams(
                dimension_semantics=("parallel", "arbitrary"),
                vmem_limit_bytes=int(vmem_limit_bytes),
            ),
        )

    args = (x2, gamma2, beta2, w1t, b1_2, w2t, b2_2)
    try:
        out = build(True)(*args)
    except Exception:
        # Fallback if this JAX build rejects single-buffering (pl.Buffered(1)).
        out = build(False)(*args)

    return out.reshape(orig_shape)


def _reference(x, gamma, beta, w1, b1, w2, b2):
    xf = x.astype(jnp.float32)
    mean = jnp.mean(xf, axis=-1, keepdims=True)
    var = jnp.mean((xf - mean) ** 2, axis=-1, keepdims=True)
    normed = (xf - mean) / jnp.sqrt(var + LN_EPS) * gamma + beta
    h = normed @ w1.T + b1
    h = 0.5 * h * (1.0 + lax.erf(h / jnp.sqrt(2.0)))
    y = h @ w2.T + b2
    return (xf + y).astype(x.dtype)


if __name__ == "__main__":
    key = jax.random.PRNGKey(0)

    def init_params(k, D):
        kw1, kb1, kw2, kb2 = jax.random.split(k, 4)
        gamma = jnp.ones((D,), jnp.float32)           # nn.LayerNorm defaults
        beta = jnp.zeros((D,), jnp.float32)
        bound = 1.0 / float(D) ** 0.5                 # nn.Linear init range
        w1 = jax.random.uniform(kw1, (D, D), jnp.float32, -bound, bound)
        b1 = jax.random.uniform(kb1, (D,), jnp.float32, -bound, bound)
        w2 = jax.random.uniform(kw2, (D, D), jnp.float32, -bound, bound)
        b2 = jax.random.uniform(kb2, (D,), jnp.float32, -bound, bound)
        return gamma, beta, w1, b1, w2, b2

    k1, k2, kx1, kx2 = jax.random.split(key, 4)

    # Case 1: small, resident-weight path (batch=2, seq=8, hidden=32).
    B, S, D = 2, 8, 32
    x = jax.random.normal(kx1, (B, S, D), dtype=jnp.float32)
    params = init_params(k1, D)
    out = jax.block_until_ready(simple_res_block(x, *params))
    ref = _reference(x, *params)
    assert out.shape == x.shape and out.dtype == x.dtype
    assert jnp.allclose(out, ref, atol=1e-4, rtol=1e-4), "mismatch (resident path)"

    # Case 2: hidden-dim streaming path + ragged row count
    # (batch=2, seq=7 -> 14 rows, hidden=256 split into two 128-wide tiles).
    B2, S2, D2 = 2, 7, 256
    x2 = jax.random.normal(kx2, (B2, S2, D2), dtype=jnp.float32)
    params2 = init_params(k2, D2)
    out2 = jax.block_until_ready(simple_res_block(x2, *params2, hidden_tile=128))
    ref2 = _reference(x2, *params2)
    assert out2.shape == x2.shape and out2.dtype == x2.dtype
    assert jnp.allclose(out2, ref2, atol=1e-4, rtol=1e-4), "mismatch (streaming path)"

    print("KERNEL_OK")
</pallas_src>

<mosaic_0001>
module attributes {stable_mosaic.version = 11 : i64} {
  func.func @_resblock_kernel(%arg0: i32, %arg1: i32, %arg2: memref<8x32xf32, #tpu.memory_space<vmem>>, %arg3: memref<1x32xf32, #tpu.memory_space<vmem>>, %arg4: memref<1x32xf32, #tpu.memory_space<vmem>>, %arg5: memref<32x32xf32, #tpu.memory_space<vmem>>, %arg6: memref<1x32xf32, #tpu.memory_space<vmem>>, %arg7: memref<32x32xf32, #tpu.memory_space<vmem>>, %arg8: memref<1x32xf32, #tpu.memory_space<vmem>>, %arg9: memref<8x32xf32, #tpu.memory_space<vmem>>, %arg10: memref<8x32xf32, #tpu.memory_space<vmem>>, %arg11: memref<8x32xf32, #tpu.memory_space<vmem>>) attributes {dimension_semantics = [#tpu.dimension_semantics<parallel>, #tpu.dimension_semantics<arbitrary>], iteration_bounds = array<i64: 2, 1>, scalar_prefetch = 0 : i64, scratch_operands = 2 : i64, tpu.core_type = #tpu.core_type<tc>, window_params = [{transform_indices = @transform_0, window_bounds = array<i64: 8, 32>}, {pipeline_mode = #tpu.pipeline_mode<synchronous>, transform_indices = @transform_1, window_bounds = array<i64: 1, 32>}, {pipeline_mode = #tpu.pipeline_mode<synchronous>, transform_indices = @transform_2, window_bounds = array<i64: 1, 32>}, {pipeline_mode = #tpu.pipeline_mode<synchronous>, transform_indices = @transform_3, window_bounds = array<i64: 32, 32>}, {pipeline_mode = #tpu.pipeline_mode<synchronous>, transform_indices = @transform_4, window_bounds = array<i64: 1, 32>}, {pipeline_mode = #tpu.pipeline_mode<synchronous>, transform_indices = @transform_5, window_bounds = array<i64: 32, 32>}, {pipeline_mode = #tpu.pipeline_mode<synchronous>, transform_indices = @transform_6, window_bounds = array<i64: 1, 32>}, {transform_indices = @transform_7, window_bounds = array<i64: 8, 32>}]} {
    %c0_i32 = arith.constant 0 : i32
    %0 = arith.cmpi eq, %arg1, %c0_i32 : i32
    %1 = arith.extui %0 : i1 to i32
    %c0_i32_0 = arith.constant 0 : i32
    %2 = arith.cmpi ne, %1, %c0_i32_0 : i32
    scf.if %2 {
      %c0_18 = arith.constant 0 : index
      %c0_19 = arith.constant 0 : index
      %25 = vector.load %arg2[%c0_18, %c0_19] : memref<8x32xf32, #tpu.memory_space<vmem>>, vector<8x32xf32>
      %cst_20 = arith.constant dense<0.000000e+00> : vector<8xf32>
      %26 = vector.multi_reduction <add>, %25, %cst_20 [1] : vector<8x32xf32> to vector<8xf32>
      %27 = vector.shape_cast %26 : vector<8xf32> to vector<8x1xf32>
      %cst_21 = arith.constant 3.200000e+01 : f32
      %28 = vector.broadcast %cst_21 : f32 to vector<8x1xf32>
      %29 = arith.divf %27, %28 : vector<8x1xf32>
      %30 = vector.broadcast %29 : vector<8x1xf32> to vector<8x32xf32>
      %31 = arith.subf %25, %30 : vector<8x32xf32>
      %32 = arith.mulf %31, %31 : vector<8x32xf32>
      %cst_22 = arith.constant dense<0.000000e+00> : vector<8xf32>
      %33 = vector.multi_reduction <add>, %32, %cst_22 [1] : vector<8x32xf32> to vector<8xf32>
      %34 = vector.shape_cast %33 : vector<8xf32> to vector<8x1xf32>
      %cst_23 = arith.constant 3.200000e+01 : f32
      %35 = vector.broadcast %cst_23 : f32 to vector<8x1xf32>
      %36 = arith.divf %34, %35 : vector<8x1xf32>
      %cst_24 = arith.constant 9.99999974E-6 : f32
      %37 = vector.broadcast %cst_24 : f32 to vector<8x1xf32>
      %38 = arith.addf %36, %37 : vector<8x1xf32>
      %39 = math.rsqrt %38 : vector<8x1xf32>
      %40 = vector.broadcast %39 : vector<8x1xf32> to vector<8x32xf32>
      %41 = arith.mulf %31, %40 : vector<8x32xf32>
      %c0_25 = arith.constant 0 : index
      %c0_26 = arith.constant 0 : index
      %42 = vector.load %arg3[%c0_25, %c0_26] : memref<1x32xf32, #tpu.memory_space<vmem>>, vector<1x32xf32>
      %43 = vector.broadcast %42 : vector<1x32xf32> to vector<8x32xf32>
      %44 = arith.mulf %41, %43 : vector<8x32xf32>
      %c0_27 = arith.constant 0 : index
      %c0_28 = arith.constant 0 : index
      %45 = vector.load %arg4[%c0_27, %c0_28] : memref<1x32xf32, #tpu.memory_space<vmem>>, vector<1x32xf32>
      %46 = vector.broadcast %45 : vector<1x32xf32> to vector<8x32xf32>
      %47 = arith.addf %44, %46 : vector<8x32xf32>
      %c0_29 = arith.constant 0 : index
      %c0_30 = arith.constant 0 : index
      %48 = vector.load %arg10[%c0_29, %c0_30] : memref<8x32xf32, #tpu.memory_space<vmem>>, vector<8x32xf32>
      tpu.vector_store %arg10[%c0_29, %c0_30], %47 {strides = array<i32>} : memref<8x32xf32, #tpu.memory_space<vmem>>, vector<8x32xf32>,
      %cst_31 = arith.constant 0.000000e+00 : f32
      %49 = vector.broadcast %cst_31 : f32 to vector<8x32xf32>
      %c0_32 = arith.constant 0 : index
      %c0_33 = arith.constant 0 : index
      %50 = vector.load %arg11[%c0_32, %c0_33] : memref<8x32xf32, #tpu.memory_space<vmem>>, vector<8x32xf32>
      tpu.vector_store %arg11[%c0_32, %c0_33], %49 {strides = array<i32>} : memref<8x32xf32, #tpu.memory_space<vmem>>, vector<8x32xf32>,
    } else {
    }
    %c0 = arith.constant 0 : index
    %c0_1 = arith.constant 0 : index
    %3 = vector.load %arg10[%c0, %c0_1] : memref<8x32xf32, #tpu.memory_space<vmem>>, vector<8x32xf32>
    %c0_2 = arith.constant 0 : index
    %c0_3 = arith.constant 0 : index
    %4 = vector.load %arg5[%c0_2, %c0_3] : memref<32x32xf32, #tpu.memory_space<vmem>>, vector<32x32xf32>
    %cst = arith.constant dense<0.000000e+00> : vector<8x32xf32>
    %5 = tpu.matmul %3, %4, %cst {dimension_numbers = #tpu.dot_dimension_numbers<[1], [0], [0], [1], [0, 0, 1, 1], [], []>} : vector<8x32xf32>, vector<32x32xf32>, vector<8x32xf32> -> vector<8x32xf32>
    %c0_4 = arith.constant 0 : index
    %c0_5 = arith.constant 0 : index
    %6 = vector.load %arg6[%c0_4, %c0_5] : memref<1x32xf32, #tpu.memory_space<vmem>>, vector<1x32xf32>
    %7 = vector.broadcast %6 : vector<1x32xf32> to vector<8x32xf32>
    %8 = arith.addf %5, %7 : vector<8x32xf32>
    %cst_6 = arith.constant 5.000000e-01 : f32
    %9 = vector.broadcast %cst_6 : f32 to vector<8x32xf32>
    %10 = arith.mulf %9, %8 : vector<8x32xf32>
    %cst_7 = arith.constant 0.707106769 : f32
    %11 = vector.broadcast %cst_7 : f32 to vector<8x32xf32>
    %12 = arith.mulf %8, %11 : vector<8x32xf32>
    %13 = math.erf %12 : vector<8x32xf32>
    %cst_8 = arith.constant 1.000000e+00 : f32
    %14 = vector.broadcast %cst_8 : f32 to vector<8x32xf32>
    %15 = arith.addf %14, %13 : vector<8x32xf32>
    %16 = arith.mulf %10, %15 : vector<8x32xf32>
    %c0_9 = arith.constant 0 : index
    %c0_10 = arith.constant 0 : index
    %17 = vector.load %arg11[%c0_9, %c0_10] : memref<8x32xf32, #tpu.memory_space<vmem>>, vector<8x32xf32>
    %c0_11 = arith.constant 0 : index
    %c0_12 = arith.constant 0 : index
    %18 = vector.load %arg7[%c0_11, %c0_12] : memref<32x32xf32, #tpu.memory_space<vmem>>, vector<32x32xf32>
    %cst_13 = arith.constant dense<0.000000e+00> : vector<8x32xf32>
    %19 = tpu.matmul %16, %18, %cst_13 {dimension_numbers = #tpu.dot_dimension_numbers<[1], [0], [0], [1], [0, 0, 1, 1], [], []>} : vector<8x32xf32>, vector<32x32xf32>, vector<8x32xf32> -> vector<8x32xf32>
    %20 = arith.addf %17, %19 : vector<8x32xf32>
    %c0_14 = arith.constant 0 : index
    %c0_15 = arith.constant 0 : index
    %21 = vector.load %arg11[%c0_14, %c0_15] : memref<8x32xf32, #tpu.memory_space<vmem>>, vector<8x32xf32>
    tpu.vector_store %arg11[%c0_14, %c0_15], %20 {strides = array<i32>} : memref<8x32xf32, #tpu.memory_space<vmem>>, vector<8x32xf32>,
    %c0_i32_16 = arith.constant 0 : i32
    %22 = arith.cmpi eq, %arg1, %c0_i32_16 : i32
    %23 = arith.extui %22 : i1 to i32
    %c0_i32_17 = arith.constant 0 : i32
    %24 = arith.cmpi ne, %23, %c0_i32_17 : i32
    scf.if %24 {
      %c0_18 = arith.constant 0 : index
      %c0_19 = arith.constant 0 : index
      %25 = vector.load %arg11[%c0_18, %c0_19] : memref<8x32xf32, #tpu.memory_space<vmem>>, vector<8x32xf32>
      %c0_20 = arith.constant 0 : index
      %c0_21 = arith.constant 0 : index
      %26 = vector.load %arg8[%c0_20, %c0_21] : memref<1x32xf32, #tpu.memory_space<vmem>>, vector<1x32xf32>
      %27 = vector.broadcast %26 : vector<1x32xf32> to vector<8x32xf32>
      %28 = arith.addf %25, %27 : vector<8x32xf32>
      %c0_22 = arith.constant 0 : index
      %c0_23 = arith.constant 0 : index
      %29 = vector.load %arg2[%c0_22, %c0_23] : memref<8x32xf32, #tpu.memory_space<vmem>>, vector<8x32xf32>
      %30 = arith.addf %29, %28 : vector<8x32xf32>
      %c0_24 = arith.constant 0 : index
      %c0_25 = arith.constant 0 : index
      %31 = vector.load %arg9[%c0_24, %c0_25] : memref<8x32xf32, #tpu.memory_space<vmem>>, vector<8x32xf32>
      tpu.vector_store %arg9[%c0_24, %c0_25], %30 {strides = array<i32>} : memref<8x32xf32, #tpu.memory_space<vmem>>, vector<8x32xf32>,
    } else {
    }
    return
  }
  func.func @transform_0(%arg0: i32, %arg1: i32) -> (i32, i32) {
    %c0_i32 = arith.constant 0 : i32
    %c0_i32_0 = arith.constant 0 : i32
    return %arg0, %c0_i32 : i32, i32
  }
  func.func @transform_1(%arg0: i32, %arg1: i32) -> (i32, i32) {
    %c0_i32 = arith.constant 0 : i32
    %c0_i32_0 = arith.constant 0 : i32
    %c0_i32_1 = arith.constant 0 : i32
    return %c0_i32, %c0_i32_0 : i32, i32
  }
  func.func @transform_2(%arg0: i32, %arg1: i32) -> (i32, i32) {
    %c0_i32 = arith.constant 0 : i32
    %c0_i32_0 = arith.constant 0 : i32
    %c0_i32_1 = arith.constant 0 : i32
    return %c0_i32, %c0_i32_0 : i32, i32
  }
  func.func @transform_3(%arg0: i32, %arg1: i32) -> (i32, i32) {
    %c0_i32 = arith.constant 0 : i32
    %c0_i32_0 = arith.constant 0 : i32
    return %c0_i32, %arg1 : i32, i32
  }
  func.func @transform_4(%arg0: i32, %arg1: i32) -> (i32, i32) {
    %c0_i32 = arith.constant 0 : i32
    %c0_i32_0 = arith.constant 0 : i32
    return %c0_i32, %arg1 : i32, i32
  }
  func.func @transform_5(%arg0: i32, %arg1: i32) -> (i32, i32) {
    %c0_i32 = arith.constant 0 : i32
    %c0_i32_0 = arith.constant 0 : i32
    return %arg1, %c0_i32 : i32, i32
  }
  func.func @transform_6(%arg0: i32, %arg1: i32) -> (i32, i32) {
    %c0_i32 = arith.constant 0 : i32
    %c0_i32_0 = arith.constant 0 : i32
    %c0_i32_1 = arith.constant 0 : i32
    return %c0_i32, %c0_i32_0 : i32, i32
  }
  func.func @transform_7(%arg0: i32, %arg1: i32) -> (i32, i32) {
    %c0_i32 = arith.constant 0 : i32
    %c0_i32_0 = arith.constant 0 : i32
    return %arg0, %c0_i32 : i32, i32
  }
}

module attributes {stable_mosaic.version = 11 : i64} {
  func.func @_resblock_kernel(%arg0: i32, %arg1: i32, %arg2: memref<8x32xf32, #tpu.memory_space<vmem>>, %arg3: memref<1x32xf32, #tpu.memory_space<vmem>>, %arg4: memref<1x32xf32, #tpu.memory_space<vmem>>, %arg5: memref<32x32xf32, #tpu.memory_space<vmem>>, %arg6: memref<1x32xf32, #tpu.memory_space<vmem>>, %arg7: memref<32x32xf32, #tpu.memory_space<vmem>>, %arg8: memref<1x32xf32, #tpu.memory_space<vmem>>, %arg9: memref<8x32xf32, #tpu.memory_space<vmem>>, %arg10: memref<8x32xf32, #tpu.memory_space<vmem>>, %arg11: memref<8x32xf32, #tpu.memory_space<vmem>>) attributes {dimension_semantics = [#tpu.dimension_semantics<parallel>, #tpu.dimension_semantics<arbitrary>], iteration_bounds = array<i64: 2, 1>, scalar_prefetch = 0 : i64, scratch_operands = 2 : i64, tpu.core_type = #tpu.core_type<tc>, window_params = [{transform_indices = @transform_0, window_bounds = array<i64: 8, 32>}, {pipeline_mode = #tpu.pipeline_mode<synchronous>, transform_indices = @transform_1, window_bounds = array<i64: 1, 32>}, {pipeline_mode = #tpu.pipeline_mode<synchronous>, transform_indices = @transform_2, window_bounds = array<i64: 1, 32>}, {transform_indices = @transform_3, window_bounds = array<i64: 32, 32>}, {transform_indices = @transform_4, window_bounds = array<i64: 1, 32>}, {transform_indices = @transform_5, window_bounds = array<i64: 32, 32>}, {pipeline_mode = #tpu.pipeline_mode<synchronous>, transform_indices = @transform_6, window_bounds = array<i64: 1, 32>}, {transform_indices = @transform_7, window_bounds = array<i64: 8, 32>}]} {
    %c0_i32 = arith.constant 0 : i32
    %0 = arith.cmpi eq, %arg1, %c0_i32 : i32
    %1 = arith.extui %0 : i1 to i32
    %c0_i32_0 = arith.constant 0 : i32
    %2 = arith.cmpi ne, %1, %c0_i32_0 : i32
    scf.if %2 {
      %c0_18 = arith.constant 0 : index
      %c0_19 = arith.constant 0 : index
      %25 = vector.load %arg2[%c0_18, %c0_19] : memref<8x32xf32, #tpu.memory_space<vmem>>, vector<8x32xf32>
      %cst_20 = arith.constant dense<0.000000e+00> : vector<8xf32>
      %26 = vector.multi_reduction <add>, %25, %cst_20 [1] : vector<8x32xf32> to vector<8xf32>
      %27 = vector.shape_cast %26 : vector<8xf32> to vector<8x1xf32>
      %cst_21 = arith.constant 3.200000e+01 : f32
      %28 = vector.broadcast %cst_21 : f32 to vector<8x1xf32>
      %29 = arith.divf %27, %28 : vector<8x1xf32>
      %30 = vector.broadcast %29 : vector<8x1xf32> to vector<8x32xf32>
      %31 = arith.subf %25, %30 : vector<8x32xf32>
      %32 = arith.mulf %31, %31 : vector<8x32xf32>
      %cst_22 = arith.constant dense<0.000000e+00> : vector<8xf32>
      %33 = vector.multi_reduction <add>, %32, %cst_22 [1] : vector<8x32xf32> to vector<8xf32>
      %34 = vector.shape_cast %33 : vector<8xf32> to vector<8x1xf32>
      %cst_23 = arith.constant 3.200000e+01 : f32
      %35 = vector.broadcast %cst_23 : f32 to vector<8x1xf32>
      %36 = arith.divf %34, %35 : vector<8x1xf32>
      %cst_24 = arith.constant 9.99999974E-6 : f32
      %37 = vector.broadcast %cst_24 : f32 to vector<8x1xf32>
      %38 = arith.addf %36, %37 : vector<8x1xf32>
      %39 = math.rsqrt %38 : vector<8x1xf32>
      %40 = vector.broadcast %39 : vector<8x1xf32> to vector<8x32xf32>
      %41 = arith.mulf %31, %40 : vector<8x32xf32>
      %c0_25 = arith.constant 0 : index
      %c0_26 = arith.constant 0 : index
      %42 = vector.load %arg3[%c0_25, %c0_26] : memref<1x32xf32, #tpu.memory_space<vmem>>, vector<1x32xf32>
      %43 = vector.broadcast %42 : vector<1x32xf32> to vector<8x32xf32>
      %44 = arith.mulf %41, %43 : vector<8x32xf32>
      %c0_27 = arith.constant 0 : index
      %c0_28 = arith.constant 0 : index
      %45 = vector.load %arg4[%c0_27, %c0_28] : memref<1x32xf32, #tpu.memory_space<vmem>>, vector<1x32xf32>
      %46 = vector.broadcast %45 : vector<1x32xf32> to vector<8x32xf32>
      %47 = arith.addf %44, %46 : vector<8x32xf32>
      %c0_29 = arith.constant 0 : index
      %c0_30 = arith.constant 0 : index
      %48 = vector.load %arg10[%c0_29, %c0_30] : memref<8x32xf32, #tpu.memory_space<vmem>>, vector<8x32xf32>
      tpu.vector_store %arg10[%c0_29, %c0_30], %47 {strides = array<i32>} : memref<8x32xf32, #tpu.memory_space<vmem>>, vector<8x32xf32>,
      %cst_31 = arith.constant 0.000000e+00 : f32
      %49 = vector.broadcast %cst_31 : f32 to vector<8x32xf32>
      %c0_32 = arith.constant 0 : index
      %c0_33 = arith.constant 0 : index
      %50 = vector.load %arg11[%c0_32, %c0_33] : memref<8x32xf32, #tpu.memory_space<vmem>>, vector<8x32xf32>
      tpu.vector_store %arg11[%c0_32, %c0_33], %49 {strides = array<i32>} : memref<8x32xf32, #tpu.memory_space<vmem>>, vector<8x32xf32>,
    } else {
    }
    %c0 = arith.constant 0 : index
    %c0_1 = arith.constant 0 : index
    %3 = vector.load %arg10[%c0, %c0_1] : memref<8x32xf32, #tpu.memory_space<vmem>>, vector<8x32xf32>
    %c0_2 = arith.constant 0 : index
    %c0_3 = arith.constant 0 : index
    %4 = vector.load %arg5[%c0_2, %c0_3] : memref<32x32xf32, #tpu.memory_space<vmem>>, vector<32x32xf32>
    %cst = arith.constant dense<0.000000e+00> : vector<8x32xf32>
    %5 = tpu.matmul %3, %4, %cst {dimension_numbers = #tpu.dot_dimension_numbers<[1], [0], [0], [1], [0, 0, 1, 1], [], []>} : vector<8x32xf32>, vector<32x32xf32>, vector<8x32xf32> -> vector<8x32xf32>
    %c0_4 = arith.constant 0 : index
    %c0_5 = arith.constant 0 : index
    %6 = vector.load %arg6[%c0_4, %c0_5] : memref<1x32xf32, #tpu.memory_space<vmem>>, vector<1x32xf32>
    %7 = vector.broadcast %6 : vector<1x32xf32> to vector<8x32xf32>
    %8 = arith.addf %5, %7 : vector<8x32xf32>
    %cst_6 = arith.constant 5.000000e-01 : f32
    %9 = vector.broadcast %cst_6 : f32 to vector<8x32xf32>
    %10 = arith.mulf %9, %8 : vector<8x32xf32>
    %cst_7 = arith.constant 0.707106769 : f32
    %11 = vector.broadcast %cst_7 : f32 to vector<8x32xf32>
    %12 = arith.mulf %8, %11 : vector<8x32xf32>
    %13 = math.erf %12 : vector<8x32xf32>
    %cst_8 = arith.constant 1.000000e+00 : f32
    %14 = vector.broadcast %cst_8 : f32 to vector<8x32xf32>
    %15 = arith.addf %14, %13 : vector<8x32xf32>
    %16 = arith.mulf %10, %15 : vector<8x32xf32>
    %c0_9 = arith.constant 0 : index
    %c0_10 = arith.constant 0 : index
    %17 = vector.load %arg11[%c0_9, %c0_10] : memref<8x32xf32, #tpu.memory_space<vmem>>, vector<8x32xf32>
    %c0_11 = arith.constant 0 : index
    %c0_12 = arith.constant 0 : index
    %18 = vector.load %arg7[%c0_11, %c0_12] : memref<32x32xf32, #tpu.memory_space<vmem>>, vector<32x32xf32>
    %cst_13 = arith.constant dense<0.000000e+00> : vector<8x32xf32>
    %19 = tpu.matmul %16, %18, %cst_13 {dimension_numbers = #tpu.dot_dimension_numbers<[1], [0], [0], [1], [0, 0, 1, 1], [], []>} : vector<8x32xf32>, vector<32x32xf32>, vector<8x32xf32> -> vector<8x32xf32>
    %20 = arith.addf %17, %19 : vector<8x32xf32>
    %c0_14 = arith.constant 0 : index
    %c0_15 = arith.constant 0 : index
    %21 = vector.load %arg11[%c0_14, %c0_15] : memref<8x32xf32, #tpu.memory_space<vmem>>, vector<8x32xf32>
    tpu.vector_store %arg11[%c0_14, %c0_15], %20 {strides = array<i32>} : memref<8x32xf32, #tpu.memory_space<vmem>>, vector<8x32xf32>,
    %c0_i32_16 = arith.constant 0 : i32
    %22 = arith.cmpi eq, %arg1, %c0_i32_16 : i32
    %23 = arith.extui %22 : i1 to i32
    %c0_i32_17 = arith.constant 0 : i32
    %24 = arith.cmpi ne, %23, %c0_i32_17 : i32
    scf.if %24 {
      %c0_18 = arith.constant 0 : index
      %c0_19 = arith.constant 0 : index
      %25 = vector.load %arg11[%c0_18, %c0_19] : memref<8x32xf32, #tpu.memory_space<vmem>>, vector<8x32xf32>
      %c0_20 = arith.constant 0 : index
      %c0_21 = arith.constant 0 : index
      %26 = vector.load %arg8[%c0_20, %c0_21] : memref<1x32xf32, #tpu.memory_space<vmem>>, vector<1x32xf32>
      %27 = vector.broadcast %26 : vector<1x32xf32> to vector<8x32xf32>
      %28 = arith.addf %25, %27 : vector<8x32xf32>
      %c0_22 = arith.constant 0 : index
      %c0_23 = arith.constant 0 : index
      %29 = vector.load %arg2[%c0_22, %c0_23] : memref<8x32xf32, #tpu.memory_space<vmem>>, vector<8x32xf32>
      %30 = arith.addf %29, %28 : vector<8x32xf32>
      %c0_24 = arith.constant 0 : index
      %c0_25 = arith.constant 0 : index
      %31 = vector.load %arg9[%c0_24, %c0_25] : memref<8x32xf32, #tpu.memory_space<vmem>>, vector<8x32xf32>
      tpu.vector_store %arg9[%c0_24, %c0_25], %30 {strides = array<i32>} : memref<8x32xf32, #tpu.memory_space<vmem>>, vector<8x32xf32>,
    } else {
    }
    return
  }
  func.func @transform_0(%arg0: i32, %arg1: i32) -> (i32, i32) {
    %c0_i32 = arith.constant 0 : i32
    %c0_i32_0 = arith.constant 0 : i32
    return %arg0, %c0_i32 : i32, i32
  }
  func.func @transform_1(%arg0: i32, %arg1: i32) -> (i32, i32) {
    %c0_i32 = arith.constant 0 : i32
    %c0_i32_0 = arith.constant 0 : i32
    %c0_i32_1 = arith.constant 0 : i32
    return %c0_i32, %c0_i32_0 : i32, i32
  }
  func.func @transform_2(%arg0: i32, %arg1: i32) -> (i32, i32) {
    %c0_i32 = arith.constant 0 : i32
    %c0_i32_0 = arith.constant 0 : i32
    %c0_i32_1 = arith.constant 0 : i32
    return %c0_i32, %c0_i32_0 : i32, i32
  }
  func.func @transform_3(%arg0: i32, %arg1: i32) -> (i32, i32) {
    %c0_i32 = arith.constant 0 : i32
    %c0_i32_0 = arith.constant 0 : i32
    return %c0_i32, %arg1 : i32, i32
  }
  func.func @transform_4(%arg0: i32, %arg1: i32) -> (i32, i32) {
    %c0_i32 = arith.constant 0 : i32
    %c0_i32_0 = arith.constant 0 : i32
    return %c0_i32, %arg1 : i32, i32
  }
  func.func @transform_5(%arg0: i32, %arg1: i32) -> (i32, i32) {
    %c0_i32 = arith.constant 0 : i32
    %c0_i32_0 = arith.constant 0 : i32
    return %arg1, %c0_i32 : i32, i32
  }
  func.func @transform_6(%arg0: i32, %arg1: i32) -> (i32, i32) {
    %c0_i32 = arith.constant 0 : i32
    %c0_i32_0 = arith.constant 0 : i32
    %c0_i32_1 = arith.constant 0 : i32
    return %c0_i32, %c0_i32_0 : i32, i32
  }
  func.func @transform_7(%arg0: i32, %arg1: i32) -> (i32, i32) {
    %c0_i32 = arith.constant 0 : i32
    %c0_i32_0 = arith.constant 0 : i32
    return %arg0, %c0_i32 : i32, i32
  }
}

</mosaic_0001>

<bundles_post_ra>
// kernel: tpu_custom_call.1
= control target key start
LH: loop header
LB: loop body
LE: loop exit
PB: predicated region body
PF: predicated region fallthrough
CT: control target
= control target key end

     0   :  { %12 = vsyncpa [#allocation5], 0  ;;  %s1378_s0 = inlined_call_operand.hbm [shape: f32[16,32], index: 0, kind: input, shape index: {}]   ;;  %s1379_s1 = inlined_call_operand.vmem [shape: f32[1,32], index: 1, kind: input, shape index: {}]   ;;  %s1380_s2 = inlined_call_operand.vmem [shape: f32[1,32], index: 2, kind: input, shape index: {}]   ;;  %s1381_s3 = inlined_call_operand.hbm [shape: f32[32,32], index: 3, kind: input, shape index: {}]   ;;  %s1382_s4 = inlined_call_operand.vmem [shape: f32[1,32], index: 4, kind: input, shape index: {}]   ;;  %s1383_s5 = inlined_call_operand.hbm [shape: f32[32,32], index: 5, kind: input, shape index: {}]   ;;  %s1384_s6 = inlined_call_operand.vmem [shape: f32[1,32], index: 6, kind: input, shape index: {}]   ;;  %s1385_s7 = inlined_call_operand.hbm [shape: f32[16,32], index: 7, kind: output, shape index: {}]  }
   0x1   :  { %14 = vsyncpa [#allocation5 + $0x1], 0 }
   0x2   :  { %15 = vsyncpa [#allocation8], 0 }
   0x3   :  { %16 = vsyncpa [#allocation6], 0 }
   0x4   :  { %18 = vsyncpa [#allocation6 + $0x1], 0  ;;  %s1099_s24 = smov 0   ;;  %s1101_s25 = smov 0  }
   0x5   :  { %s1103_s26 = smov 0   ;;  %s1105_s27 = smov 0  }
   0x6   :  { %s1107_s28 = smov 0   ;;  %s1109_s29 = smov 0  }
   0x7 LB: > { %1392 = sst [smem:[#allocation14_spill]] %s1028_s24  ;;  %s716_s30 = sadd.s32 4294967295, %s1048_s29   ;;  %s1048_s29 = sphi %s1109_s29, %s24_s29   ;;  %s1044_s28 = sphi %s1107_s28, %s1413_s28   ;;  %s1040_s27 = sphi %s1105_s27, %s1412_s27   ;;  %s1036_s26 = sphi %s1103_s26, %s1411_s26   ;;  %s1032_s25 = sphi %s1101_s25, %s1410_s25   ;;  %s1028_s24 = sphi %s1099_s24, %s1409_s24  }
   0x8   : > { %s717_s8 = sadd.s32 4294967294, %s1048_s29   ;;  %p56_p0 = scmp.ne.s32.totalorder %s1032_s25, %s1028_s24 }
   0x9   : > { %p1133_p1 = scmp.eq.s32.totalorder %s716_s30, 0  ;;  %p1137_p2 = scmp.eq.s32.totalorder %s716_s30, 1 }
   0xa   : > { %p227_p3 = scmp.eq.s32.totalorder %s717_s8, 1  ;;  %p718_p5 = scmp.ge.s32.totalorder %s1048_s29, 1 }
   0xb   : > { %s1393_s9 = scalar_select %p1133_p1, 1, 0 }
   0xc   : > { %p1143_p4 = por %p1133_p1, %p56_p0  ;;  %p1148_p6 = por %p227_p3, %p56_p0 }
   0xd   : > { %p234_p7 = scmp.lt.s32.totalorder %s1048_s29, 3  ;;  %s1050_s14 = smov [#allocation7]  }
   0xe   : > { %s1395_s11 = scalar_select %p1143_p4, 1, 0 }
   0xf   : > { %s1396_s12 = scalar_select %p1148_p6, 1, 0 }
  0x10   : > { %p1153_p8 = pnand %p718_p5, %p234_p7  ;;  %s254_s15 = sshll.u32 %s1050_s14, 4  ;;  %s1157_s15 = int_to_ptr.vmem [resolvable:$true] %s254_s15 }
  0x11   : > { %1397 = sst [smem:[#allocation15_spill]] %s1396_s12  ;;  %s1051_s17 = smov [#allocation9]  }
  0x12   : > { %p796_p9 = pneg %p1153_p8  ;;  %s276_s18 = sshll.u32 %s1051_s17, 4  ;;  %s1168_s18 = int_to_ptr.vmem [resolvable:$true] %s276_s18 }
  0x13   : > { %s876_s21 = scalar_lea.hbm %s1381_s3, 512 }
  0x14   : > { %p1164_p11 = pnand %p796_p9, %p1133_p1  ;;  %p877_p12 = scmp.ne.s32.totalorder %s1381_s3, %s876_s21 }
  0x15   : > { %p883_p5 = scmp.lt.u32.totalorder %s876_s21, %s1381_s3 }
  0x16   : > { %p878_p13 = pneg %p1164_p11 }
  0x18   : > { %p879_p0 = pnand %p878_p13, %p877_p12 }
  0x1a   : > { %p880_p3 = pneg %p879_p0 }
  0x1c   : > { %p885_p7 = pnand %p883_p5, %p880_p3 }
  0x1e   : > { %888 = shalt.err (!%p885_p7)
}
  0x1f   : > { %s889_s14 = scalar_lea.vmem %s1157_s15, 512  ;;  %p897_p1 = scmp.lt.s32.totalorder %s1157_s15, %s1157_s15 }
  0x20   : > { %p890_p9 = scmp.ne.s32.totalorder %s1157_s15, %s889_s14  ;;  %p898_p12 = scmp.lt.s32.totalorder %s889_s14, %s889_s14 }
  0x22   : > { %p892_p10 = pnand %p890_p9, %p878_p13  ;;  %p899_p0 = por %p898_p12, %p897_p1 }
  0x24   : > { %p893_p6 = pneg %p892_p10 }
  0x26   : > { %p900_p4 = pnand %p899_p0, %p893_p6 }
  0x28   : > { %903 = shalt.err (!%p900_p4)
}
  0x29   : > { %s1052_s17 = smov 128   ;;  %s1053_s19 = smov 8  }
  0x2a   : > { %799 = dma.hbm_to_vmem [thread:$0]  (!%p1164_p11), %s1381_s3, 512, %s1157_s15, [#allocation8], %s1052_s17, %s1052_s17, %s1053_s19  }
  0x2b   : > { %s904_s30 = scalar_lea.hbm %s1383_s5, 512 }
  0x2c   : > { %p905_p1 = scmp.ne.s32.totalorder %s1383_s5, %s904_s30  ;;  %p911_p10 = scmp.lt.u32.totalorder %s904_s30, %s1383_s5 }
  0x2e   : > { %p907_p4 = pnand %p905_p1, %p878_p13 }
  0x30   : > { %p908_p6 = pneg %p907_p4 }
  0x32   : > { %p913_p3 = pnand %p911_p10, %p908_p6 }
  0x34   : > { %916 = shalt.err (!%p913_p3)
}
  0x35   : > { %s917_s15 = scalar_lea.vmem %s1168_s18, 512  ;;  %p925_p12 = scmp.lt.s32.totalorder %s1168_s18, %s1168_s18 }
  0x36   : > { %p918_p5 = scmp.ne.s32.totalorder %s1168_s18, %s917_s15  ;;  %p926_p0 = scmp.lt.s32.totalorder %s917_s15, %s917_s15 }
  0x38   : > { %p920_p7 = pnand %p918_p5, %p878_p13  ;;  %p927_p1 = por %p926_p0, %p925_p12 }
  0x3a   : > { %p921_p9 = pneg %p920_p7 }
  0x3c   : > { %p928_p4 = pnand %p927_p1, %p921_p9 }
  0x3e   : > { %931 = shalt.err (!%p928_p4)
}
  0x3f   : > { %802 = dma.hbm_to_vmem [thread:$0]  (!%p1164_p11), %s1383_s5, 512, %s1168_s18, [#allocation8], %s1052_s17, %s1052_s17, %s1053_s19  }
  0x40   : > { %s36_s20 = sadd.s32 1, %s1044_s28  ;;  %s43_s21 = sadd.s32 1, %s1036_s26 }
  0x41   : > { %p38_p13 = scmp.ge.s32.totalorder %s36_s20, 2  ;;  %p50_p6 = scmp.ne.s32.totalorder %s1036_s26, %s1032_s25 }
  0x42   : > { %p51_p10 = scmp.eq.s32.totalorder %s1048_s29, 0  ;;  %p813_p3 = scmp.lt.s32.totalorder %s1048_s29, 2 }
  0x43   : > { %s1415_s20 = smov (%p38_p13, %s36_s20), 0  ;;  %p1232_p7 = por %p1137_p2, %p50_p6 }
  0x44   : > { %p52_p5 = por %p51_p10, %p50_p6  ;;  %s40_s22 = ssub.s32 %s1044_s28, %s1415_s20 }
  0x45   : > { %s1400_s16 = scalar_select %p1232_p7, 1, 0 }
  0x46   : > { %s293_s23 = sand.u32 1, %s1036_s26   ;;  %p41_p9 = scmp.eq.s32.totalorder %s40_s22, 0 }
  0x47   : > { %s723_s18 = sshll.u32 %s293_s23, 3  ;;  %s724_s17 = sshll.u32 %s1044_s28, 7 }
  0x48   : > { %s1241_s19 = scalar_select %p41_p9, %s1036_s26, %s43_s21  }
  0x49   : > { %s1246_s14 = scalar_lea.hbm %s1378_s0, %s724_s17  ;;  %s297_s10 = scalar_lea.vmem [#allocation4], %s723_s18 }
  0x4a   : > { %s304_s15 = sshll.u32 %s297_s10, 4  ;;  %p1250_p2 = pnand %p813_p3, %p52_p5  ;;  %s1254_s15 = int_to_ptr.vmem [resolvable:$true] %s304_s15 }
  0x4b   : > { %s294_s12 = scalar_lea.sflag [#allocation5], %s293_s23  ;;  %s932_s21 = scalar_lea.hbm %s1246_s14, 128 }
  0x4c   : > { %p933_p11 = scmp.ne.s32.totalorder %s1246_s14, %s932_s21  ;;  %p934_p12 = pneg %p1250_p2 }
  0x4d   : > { %s937_s17 = scalar_lea.hbm %s1378_s0, 256  ;;  %p938_p4 = scmp.lt.u32.totalorder %s1246_s14, %s1378_s0 }
  0x4e   : > { %p935_p0 = pnand %p934_p12, %p933_p11  ;;  %p939_p13 = scmp.lt.u32.totalorder %s937_s17, %s932_s21 }
  0x4f   : > { %p941_p10 = scmp.lt.u32.totalorder %s932_s21, %s1246_s14 }
  0x50   : > { %p936_p1 = pneg %p935_p0  ;;  %p940_p6 = por %p939_p13, %p938_p4 }
  0x52   : > { %p942_p3 = por %p941_p10, %p940_p6 }
  0x54   : > { %p943_p5 = pnand %p942_p3, %p936_p1 }
  0x56   : > { %946 = shalt.err (!%p943_p5)
}
  0x57   : > { %s947_s23 = scalar_lea.vmem %s1254_s15, 128  ;;  %s1054_s10 = smov [#allocation4]  }
  0x58   : > { %p948_p9 = scmp.ne.s32.totalorder %s1254_s15, %s947_s23  ;;  %s952_s22 = sshll.u32 %s1054_s10, 4  ;;  %s953_s22 = int_to_ptr.vmem [resolvable:$false] %s952_s22 }
  0x59   : > { %s954_s18 = scalar_lea.vmem %s953_s22, 256  ;;  %p955_p7 = scmp.lt.s32.totalorder %s1254_s15, %s953_s22 }
  0x5a   : > { %p950_p11 = pnand %p948_p9, %p934_p12  ;;  %p956_p4 = scmp.lt.s32.totalorder %s954_s18, %s947_s23 }
  0x5c   : > { %p951_p0 = pneg %p950_p11  ;;  %p957_p13 = por %p956_p4, %p955_p7 }
  0x5e   : > { %p958_p6 = pnand %p957_p13, %p951_p0 }
  0x60   : > { %961 = shalt.err (!%p958_p6)
}
  0x61   : > { %806 = dma.hbm_to_vmem [thread:$0]  (!%p1250_p2), %s1246_s14, 128, %s1254_s15, %s294_s12  }
  0x62   : > { %313 = sbr.rel (%p1153_p8) target bundleno = 902 (0x386), region = 48  ;;  %s1284_s21 = sand.u32 (!%p1153_p8), 1, %s1032_s25  }
  0x63   : > { %s726_s17 = sshll.u32 (!%p1153_p8), %s1284_s21, 3  ;;  %s316_s30 = scalar_lea.sflag (!%p1153_p8), [#allocation5], %s1284_s21 }
  0x64   : > { %s319_s8 = scalar_lea.vmem (!%p1153_p8), [#allocation4], %s726_s17  ;;  %p1402_p7 = scmp.ne.s32.totalorder (!%p1153_p8), %s1395_s11, 0 }
  0x69   : > { %1015 = dma.done.wait (%p1402_p7), %s316_s30, 128  }
  0x6a   : > { %1017 = vsyncadd (%p1402_p7), %s316_s30, 4294967168  ;;  %p1403_p2 = scmp.ne.s32.totalorder %s1393_s9, 0 }
  0x6c   : > { %1019 = dma.done.wait (%p1403_p2), [#allocation8], 1024  }
  0x6d   : > { %1021 = vsyncadd (%p1403_p2), [#allocation8], 4294966272  ;;  %vm370_vm0 = vcmask 261120   ;;  %v1298_v0 = vld [vmem:[%s319_s8] sm:$0xff]  ;;  %v404_v7 = vld [vmem:[#allocation7] sm:$0xff]  ;;  %v1055_v10 = vmov 0.0|0.0  }
  0x6e   : > { %v371_v1 = vsel %vm370_vm0, %v1298_v0, 0.0  ;;  %v405_v8 = vld [vmem:[#allocation7 + $0x8] sm:$0xff]  ;;  %772 = vmatprep.subr.bf16.mxu0 %v1055_v10  ;;  %v406_v11 = vld [vmem:[#allocation7 + $0x10] sm:$0xff]  ;;  %v407_v12 = vld [vmem:[#allocation7 + $0x18] sm:$0xff]  ;;  %778 = vmatprep.subr.bf16.mxu1 %v1055_v10  ;;  %v1056_v14 = vmov 0.0   ;;  %vm1057_vm1 = vmmov 0  }
  0x6f   : > { %372 = vadd.xlane.f32.xlu0 %v371_v1  ;;  %v773_v9 = vpack.c.bf16 %v405_v8, %v404_v7  ;;  %v776_v13 = vpack.c.bf16 %v407_v12, %v406_v11  ;;  %402 = vst.msk [vmem:[#allocation3] sm:$0xff] %vm370_vm0, %v1056_v14  ;;  %758 = vmatprep.mubr.msk.f32.mxu0 %vm1057_vm1, %v1056_v14  ;;  %v730_v19 = vld [vmem:[%s1379_s1] ss:$0 sm:$0xff]  ;;  %v496_v26 = vld [vmem:[#allocation9 + $0x8] sm:$0xff]  ;;  %v497_v28 = vld [vmem:[#allocation9 + $0x10] sm:$0xff]  ;;  %s737_s10 = sshll.u32 %s1040_s27, 7 }
  0x70   : > { %769 = vmatprep.mubr.msk.f32.mxu1 %vm1057_vm1, %v1056_v14  ;;  %v731_v21 = vld [vmem:[%s1380_s2] ss:$0 sm:$0xff]  ;;  %v498_v29 = vld [vmem:[#allocation9 + $0x18] sm:$0xff]  ;;  %s360_s22 = scalar_lea.vmem [#allocation10], %s726_s17  ;;  %s1328_s9 = scalar_lea.hbm %s1385_s7, %s737_s10 }
  0x71   : > { %774 = vmatpush3.bf16.msra.mxu0 %v773_v9  ;;  %v495_v25 = vld [vmem:[#allocation9] sm:$0xff]  ;;  %v782_v30 = vpack.c.bf16 %v498_v29, %v497_v28  ;;  %s603_s18 = sshll.u32 %s360_s22, 4  ;;  %s590_s11 = scalar_lea.sflag [#allocation6], %s1284_s21  ;;  %s1330_s18 = int_to_ptr.vmem [resolvable:$true] %s603_s18 }
  0x72   : > { %775 = vmatprep.subr.bf16.mxu0 %v1055_v10  ;;  %v779_v27 = vpack.c.bf16 %v496_v26, %v495_v25  ;;  %v732_v31 = vld [vmem:[%s1382_s4] ss:$0 sm:$0xff]  ;;  %s962_s27 = scalar_lea.vmem %s1330_s18, 128  ;;  %p1404_p12 = scmp.ne.s32.totalorder %s1400_s16, 0 }
  0x73   : > { %v735_v44 = vld [vmem:[%s1384_s6] ss:$0 sm:$0xff]  ;;  %p963_p8 = scmp.ne.s32.totalorder %s1330_s18, %s962_s27  ;;  %s1058_s17 = smov [#allocation10]  }
  0x74   : > { %780 = vmatpush3.bf16.msra.mxu1 %v779_v27  ;;  %s966_s13 = sshll.u32 %s1058_s17, 4  ;;  %s967_s13 = int_to_ptr.vmem [resolvable:$false] %s966_s13 }
  0x75   : > { %777 = vmatpush3.bf16.msra.mxu0 %v776_v13  ;;  %781 = vmatprep.subr.bf16.mxu1 %v1055_v10  ;;  %p964_p1 = pnand %p963_p8, %p1404_p12  ;;  %s968_s14 = scalar_lea.vmem %s967_s13, 256 }
  0x76   : > { %v494_v40 = vld [vmem:[#allocation3] sm:$0xff]  ;;  %p969_p3 = scmp.lt.s32.totalorder %s1330_s18, %s967_s13  ;;  %p970_p5 = scmp.lt.s32.totalorder %s968_s14, %s962_s27 }
  0x77   : > { %p965_p10 = pneg %p964_p1 }
  0x78   : > { %783 = vmatpush3.bf16.msra.mxu1 %v782_v30  ;;  %p971_p9 = por %p970_p5, %p969_p3 }
  0x7a   : > { %p972_p11 = pnand %p971_p9, %p965_p10 }
  0xfc   : > { %v373_v2 = vpop.xlane.xlu0 %372 }
  0xfd   : > { %v375_v3 = vmul.f32 0.03125, %v373_v2 }
  0xff   : > { %v376_v4 = vsub.f32 %v1298_v0, %v375_v3 }
 0x101   : > { %v377_v5 = vmul.f32 %v376_v4, %v376_v4 }
 0x103   : > { %v378_v6 = vsel %vm370_vm0, %v377_v5, 0.0 }
 0x104   : > { %379 = vadd.xlane.f32.xlu0 %v378_v6 }
 0x191   : > { %v380_v15 = vpop.xlane.xlu0 %379 }
 0x192   : > { %v381_v16 = vmul.f32 0.03125, %v380_v15 }
 0x194   : > { %v382_v17 = vadd.f32 1e-05, %v381_v16 }
 0x196   : > { %872 = vrsqrt.f32 %v382_v17 }
 0x1a0   : > { %v873_v18 = vpop.eup %872 }
 0x1a1   : > { %v384_v20 = vmul.f32 %v873_v18, %v376_v4 }
 0x1a3   : > { %v392_v22 = vmul.f32 %v730_v19, %v384_v20 }
 0x1a5   : > { %v400_v23 = vadd.f32 %v731_v21, %v392_v22 }
 0x1a7   : > { %401 = vst.msk [vmem:[#allocation2] sm:$0xff] %vm370_vm0, %v400_v23 }
 0x1ae   : > { %v403_v24 = vld [vmem:[#allocation2] sm:$0xff] }
 0x1af   : > { %759 = vmatmul.mubr.msk.f32.vlgmr.msra.gmra.mrb[0].mxu0 %vm370_vm0, %v403_v24 }
 0x282   : > { %v485_v32 = vpop.f32.mrb[0].mxu0 }
 0x283   : > { %v486_v33 = vadd.f32 %v732_v31, %v485_v32  ;;  %v760_v34 = vpop.f32.mrb[1].mxu0 }
 0x285   : > { %v490_v35 = vmul.f32 0.70710677, %v486_v33  ;;  %v489_v37 = vmul.f32 0.5, %v486_v33 }
 0x287   : > { %874 = verf.f32 %v490_v35 }
 0x291   : > { %v875_v36 = vpop.eup %874 }
 0x292   : > { %v492_v38 = vadd.f32 1.0, %v875_v36 }
 0x294   : > { %v493_v39 = vmul.f32 %v492_v38, %v489_v37 }
 0x296   : > { %770 = vmatmul.mubr.msk.f32.vlgmr.msra.gmra.mrb[0].mxu1 %vm370_vm0, %v493_v39 }
 0x369   : > { %v568_v41 = vpop.f32.mrb[0].mxu1 }
 0x36a   : > { %v572_v42 = vadd.f32 %v568_v41, %v494_v40  ;;  %v771_v43 = vpop.f32.mrb[1].mxu1 }
 0x36c   : > { %573 = vst.msk [vmem:[#allocation3] sm:$0xff] %vm370_vm0, %v572_v42 }
 0x373   : > { %v577_v45 = vld [vmem:[#allocation3] sm:$0xff] }
 0x374   : > { %v585_v46 = vadd.f32 %v735_v44, %v577_v45 }
 0x376   : > { %v587_v47 = vadd.f32 %v585_v46, %v1298_v0 }
 0x378   : > { %588 = vst.msk [vmem:[%s360_s22] sm:$0xff] %vm370_vm0, %v587_v47 }
 0x379   : > { %975 = shalt.err (!%p972_p11)
}
 0x37a   : > { %s976_s21 = scalar_lea.hbm %s1328_s9, 128  ;;  %s980_s12 = scalar_lea.hbm %s1385_s7, 256 }
 0x37b   : > { %p977_p0 = scmp.ne.s32.totalorder %s1328_s9, %s976_s21  ;;  %p981_p6 = scmp.lt.u32.totalorder %s1328_s9, %s1385_s7 }
 0x37c   : > { %p982_p7 = scmp.lt.u32.totalorder %s980_s12, %s976_s21  ;;  %p984_p8 = scmp.lt.u32.totalorder %s976_s21, %s1328_s9 }
 0x37d   : > { %p978_p4 = pnand %p977_p0, %p1404_p12 }
 0x37e   : > { %p983_p2 = por %p982_p7, %p981_p6 }
 0x37f   : > { %p979_p13 = pneg %p978_p4 }
 0x380   : > { %p985_p1 = por %p984_p8, %p983_p2 }
 0x382   : > { %p986_p10 = pnand %p985_p1, %p979_p13 }
 0x384   : > { %989 = shalt.err (!%p986_p10)
}
 0x385   : > { %794 = dma.vmem_to_hbm [thread:$0]  (%p1404_p12), %s1330_s18, 128, %s1328_s9, %s590_s11  }
 0x386 PF: > { %s1405_s22 = sld [smem:[#allocation14_spill]]  ;;  %s1406_s30 = sld [smem:[#allocation15_spill]] }
 0x387   : > { %p1408_p5 = scmp.ge.s32.totalorder %s1048_s29, 2 }
 0x38c   : > { %s615_s8 = sand.u32 1, %s1405_s22   ;;  %p1407_p3 = scmp.ne.s32.totalorder %s1406_s30, 0 }
 0x38d   : > { %s616_s27 = scalar_lea.sflag [#allocation6], %s615_s8 }
 0x38e   : > { %p808_p9 = pnand %p1408_p5, %p1407_p3 }
 0x390   : > { %1023 = dma.done.wait (!%p808_p9), %s616_s27, 128  }
 0x391   : > { %1025 = vsyncadd (!%p808_p9), %s616_s27, 4294967168  ;;  %s24_s29 = sadd.s32 1, %s1048_s29   ;;  %s1409_s24 = smov %s1032_s25 }
 0x392   : > { %p21_p11 = scmp.ge.s32.totalorder %s24_s29, 4   ;;  %s1410_s25 = smov %s1036_s26 }
 0x393   : > { %s1411_s26 = smov %s1241_s19  ;;  %s1412_s27 = smov %s1044_s28 }
 0x394   : > { %s1413_s28 = smov %s1415_s20  ;;  %23 = sbr.rel (!%p21_p11) target bundleno = 7 (0x7), region = 114 }
 0x39b   :  { %621 = vsyncpa [#allocation5], 1 }
 0x39c   :  { %623 = vsyncpa [#allocation5 + $0x1], 1 }
 0x39d   :  { %624 = vsyncpa [#allocation8], 1 }
 0x39e   :  { %625 = vsyncpa [#allocation6], 1 }
 0x39f   :  { %627 = vsyncpa [#allocation6 + $0x1], 1 }

// kernel: tpu_custom_call.1
= control target key start
LH: loop header
LB: loop body
LE: loop exit
PB: predicated region body
PF: predicated region fallthrough
CT: control target
= control target key end

     0   :  { %12 = vsyncpa [#allocation5], 0  ;;  %s1378_s0 = inlined_call_operand.hbm [shape: f32[16,32], index: 0, kind: input, shape index: {}]   ;;  %s1379_s1 = inlined_call_operand.vmem [shape: f32[1,32], index: 1, kind: input, shape index: {}]   ;;  %s1380_s2 = inlined_call_operand.vmem [shape: f32[1,32], index: 2, kind: input, shape index: {}]   ;;  %s1381_s3 = inlined_call_operand.hbm [shape: f32[32,32], index: 3, kind: input, shape index: {}]   ;;  %s1382_s4 = inlined_call_operand.vmem [shape: f32[1,32], index: 4, kind: input, shape index: {}]   ;;  %s1383_s5 = inlined_call_operand.hbm [shape: f32[32,32], index: 5, kind: input, shape index: {}]   ;;  %s1384_s6 = inlined_call_operand.vmem [shape: f32[1,32], index: 6, kind: input, shape index: {}]   ;;  %s1385_s7 = inlined_call_operand.hbm [shape: f32[16,32], index: 7, kind: output, shape index: {}]  }
   0x1   :  { %14 = vsyncpa [#allocation5 + $0x1], 0 }
   0x2   :  { %15 = vsyncpa [#allocation8], 0 }
   0x3   :  { %16 = vsyncpa [#allocation6], 0 }
   0x4   :  { %18 = vsyncpa [#allocation6 + $0x1], 0  ;;  %s1099_s24 = smov 0   ;;  %s1101_s25 = smov 0  }
   0x5   :  { %s1103_s26 = smov 0   ;;  %s1105_s27 = smov 0  }
   0x6   :  { %s1107_s28 = smov 0   ;;  %s1109_s29 = smov 0  }
   0x7 LB: > { %1392 = sst [smem:[#allocation14_spill]] %s1028_s24  ;;  %s716_s30 = sadd.s32 4294967295, %s1048_s29   ;;  %s1048_s29 = sphi %s1109_s29, %s24_s29   ;;  %s1044_s28 = sphi %s1107_s28, %s1413_s28   ;;  %s1040_s27 = sphi %s1105_s27, %s1412_s27   ;;  %s1036_s26 = sphi %s1103_s26, %s1411_s26   ;;  %s1032_s25 = sphi %s1101_s25, %s1410_s25   ;;  %s1028_s24 = sphi %s1099_s24, %s1409_s24  }
   0x8   : > { %s717_s8 = sadd.s32 4294967294, %s1048_s29   ;;  %p56_p0 = scmp.ne.s32.totalorder %s1032_s25, %s1028_s24 }
   0x9   : > { %p1133_p1 = scmp.eq.s32.totalorder %s716_s30, 0  ;;  %p1137_p2 = scmp.eq.s32.totalorder %s716_s30, 1 }
   0xa   : > { %p227_p3 = scmp.eq.s32.totalorder %s717_s8, 1  ;;  %p718_p5 = scmp.ge.s32.totalorder %s1048_s29, 1 }
   0xb   : > { %s1393_s9 = scalar_select %p1133_p1, 1, 0 }
   0xc   : > { %p1143_p4 = por %p1133_p1, %p56_p0  ;;  %p1148_p6 = por %p227_p3, %p56_p0 }
   0xd   : > { %p234_p7 = scmp.lt.s32.totalorder %s1048_s29, 3  ;;  %s1050_s14 = smov [#allocation7]  }
   0xe   : > { %s1395_s11 = scalar_select %p1143_p4, 1, 0 }
   0xf   : > { %s1396_s12 = scalar_select %p1148_p6, 1, 0 }
  0x10   : > { %p1153_p8 = pnand %p718_p5, %p234_p7  ;;  %s254_s15 = sshll.u32 %s1050_s14, 4  ;;  %s1157_s15 = int_to_ptr.vmem [resolvable:$true] %s254_s15 }
  0x11   : > { %1397 = sst [smem:[#allocation15_spill]] %s1396_s12  ;;  %s1051_s17 = smov [#allocation9]  }
  0x12   : > { %p796_p9 = pneg %p1153_p8  ;;  %s276_s18 = sshll.u32 %s1051_s17, 4  ;;  %s1168_s18 = int_to_ptr.vmem [resolvable:$true] %s276_s18 }
  0x13   : > { %s876_s21 = scalar_lea.hbm %s1381_s3, 512 }
  0x14   : > { %p1164_p11 = pnand %p796_p9, %p1133_p1  ;;  %p877_p12 = scmp.ne.s32.totalorder %s1381_s3, %s876_s21 }
  0x15   : > { %p883_p5 = scmp.lt.u32.totalorder %s876_s21, %s1381_s3 }
  0x16   : > { %p878_p13 = pneg %p1164_p11 }
  0x18   : > { %p879_p0 = pnand %p878_p13, %p877_p12 }
  0x1a   : > { %p880_p3 = pneg %p879_p0 }
  0x1c   : > { %p885_p7 = pnand %p883_p5, %p880_p3 }
  0x1e   : > { %888 = shalt.err (!%p885_p7)
}
  0x1f   : > { %s889_s14 = scalar_lea.vmem %s1157_s15, 512  ;;  %p897_p1 = scmp.lt.s32.totalorder %s1157_s15, %s1157_s15 }
  0x20   : > { %p890_p9 = scmp.ne.s32.totalorder %s1157_s15, %s889_s14  ;;  %p898_p12 = scmp.lt.s32.totalorder %s889_s14, %s889_s14 }
  0x22   : > { %p892_p10 = pnand %p890_p9, %p878_p13  ;;  %p899_p0 = por %p898_p12, %p897_p1 }
  0x24   : > { %p893_p6 = pneg %p892_p10 }
  0x26   : > { %p900_p4 = pnand %p899_p0, %p893_p6 }
  0x28   : > { %903 = shalt.err (!%p900_p4)
}
  0x29   : > { %s1052_s17 = smov 128   ;;  %s1053_s19 = smov 8  }
  0x2a   : > { %799 = dma.hbm_to_vmem [thread:$0]  (!%p1164_p11), %s1381_s3, 512, %s1157_s15, [#allocation8], %s1052_s17, %s1052_s17, %s1053_s19  }
  0x2b   : > { %s904_s30 = scalar_lea.hbm %s1383_s5, 512 }
  0x2c   : > { %p905_p1 = scmp.ne.s32.totalorder %s1383_s5, %s904_s30  ;;  %p911_p10 = scmp.lt.u32.totalorder %s904_s30, %s1383_s5 }
  0x2e   : > { %p907_p4 = pnand %p905_p1, %p878_p13 }
  0x30   : > { %p908_p6 = pneg %p907_p4 }
  0x32   : > { %p913_p3 = pnand %p911_p10, %p908_p6 }
  0x34   : > { %916 = shalt.err (!%p913_p3)
}
  0x35   : > { %s917_s15 = scalar_lea.vmem %s1168_s18, 512  ;;  %p925_p12 = scmp.lt.s32.totalorder %s1168_s18, %s1168_s18 }
  0x36   : > { %p918_p5 = scmp.ne.s32.totalorder %s1168_s18, %s917_s15  ;;  %p926_p0 = scmp.lt.s32.totalorder %s917_s15, %s917_s15 }
  0x38   : > { %p920_p7 = pnand %p918_p5, %p878_p13  ;;  %p927_p1 = por %p926_p0, %p925_p12 }
  0x3a   : > { %p921_p9 = pneg %p920_p7 }
  0x3c   : > { %p928_p4 = pnand %p927_p1, %p921_p9 }
  0x3e   : > { %931 = shalt.err (!%p928_p4)
}
  0x3f   : > { %802 = dma.hbm_to_vmem [thread:$0]  (!%p1164_p11), %s1383_s5, 512, %s1168_s18, [#allocation8], %s1052_s17, %s1052_s17, %s1053_s19  }
  0x40   : > { %s36_s20 = sadd.s32 1, %s1044_s28  ;;  %s43_s21 = sadd.s32 1, %s1036_s26 }
  0x41   : > { %p38_p13 = scmp.ge.s32.totalorder %s36_s20, 2  ;;  %p50_p6 = scmp.ne.s32.totalorder %s1036_s26, %s1032_s25 }
  0x42   : > { %p51_p10 = scmp.eq.s32.totalorder %s1048_s29, 0  ;;  %p813_p3 = scmp.lt.s32.totalorder %s1048_s29, 2 }
  0x43   : > { %s1415_s20 = smov (%p38_p13, %s36_s20), 0  ;;  %p1232_p7 = por %p1137_p2, %p50_p6 }
  0x44   : > { %p52_p5 = por %p51_p10, %p50_p6  ;;  %s40_s22 = ssub.s32 %s1044_s28, %s1415_s20 }
  0x45   : > { %s1400_s16 = scalar_select %p1232_p7, 1, 0 }
  0x46   : > { %s293_s23 = sand.u32 1, %s1036_s26   ;;  %p41_p9 = scmp.eq.s32.totalorder %s40_s22, 0 }
  0x47   : > { %s723_s18 = sshll.u32 %s293_s23, 3  ;;  %s724_s17 = sshll.u32 %s1044_s28, 7 }
  0x48   : > { %s1241_s19 = scalar_select %p41_p9, %s1036_s26, %s43_s21  }
  0x49   : > { %s1246_s14 = scalar_lea.hbm %s1378_s0, %s724_s17  ;;  %s297_s10 = scalar_lea.vmem [#allocation4], %s723_s18 }
  0x4a   : > { %s304_s15 = sshll.u32 %s297_s10, 4  ;;  %p1250_p2 = pnand %p813_p3, %p52_p5  ;;  %s1254_s15 = int_to_ptr.vmem [resolvable:$true] %s304_s15 }
  0x4b   : > { %s294_s12 = scalar_lea.sflag [#allocation5], %s293_s23  ;;  %s932_s21 = scalar_lea.hbm %s1246_s14, 128 }
  0x4c   : > { %p933_p11 = scmp.ne.s32.totalorder %s1246_s14, %s932_s21  ;;  %p934_p12 = pneg %p1250_p2 }
  0x4d   : > { %s937_s17 = scalar_lea.hbm %s1378_s0, 256  ;;  %p938_p4 = scmp.lt.u32.totalorder %s1246_s14, %s1378_s0 }
  0x4e   : > { %p935_p0 = pnand %p934_p12, %p933_p11  ;;  %p939_p13 = scmp.lt.u32.totalorder %s937_s17, %s932_s21 }
  0x4f   : > { %p941_p10 = scmp.lt.u32.totalorder %s932_s21, %s1246_s14 }
  0x50   : > { %p936_p1 = pneg %p935_p0  ;;  %p940_p6 = por %p939_p13, %p938_p4 }
  0x52   : > { %p942_p3 = por %p941_p10, %p940_p6 }
  0x54   : > { %p943_p5 = pnand %p942_p3, %p936_p1 }
  0x56   : > { %946 = shalt.err (!%p943_p5)
}
  0x57   : > { %s947_s23 = scalar_lea.vmem %s1254_s15, 128  ;;  %s1054_s10 = smov [#allocation4]  }
  0x58   : > { %p948_p9 = scmp.ne.s32.totalorder %s1254_s15, %s947_s23  ;;  %s952_s22 = sshll.u32 %s1054_s10, 4  ;;  %s953_s22 = int_to_ptr.vmem [resolvable:$false] %s952_s22 }
  0x59   : > { %s954_s18 = scalar_lea.vmem %s953_s22, 256  ;;  %p955_p7 = scmp.lt.s32.totalorder %s1254_s15, %s953_s22 }
  0x5a   : > { %p950_p11 = pnand %p948_p9, %p934_p12  ;;  %p956_p4 = scmp.lt.s32.totalorder %s954_s18, %s947_s23 }
  0x5c   : > { %p951_p0 = pneg %p950_p11  ;;  %p957_p13 = por %p956_p4, %p955_p7 }
  0x5e   : > { %p958_p6 = pnand %p957_p13, %p951_p0 }
  0x60   : > { %961 = shalt.err (!%p958_p6)
}
  0x61   : > { %806 = dma.hbm_to_vmem [thread:$0]  (!%p1250_p2), %s1246_s14, 128, %s1254_s15, %s294_s12  }
  0x62   : > { %313 = sbr.rel (%p1153_p8) target bundleno = 902 (0x386), region = 48  ;;  %s1284_s21 = sand.u32 (!%p1153_p8), 1, %s1032_s25  }
  0x63   : > { %s726_s17 = sshll.u32 (!%p1153_p8), %s1284_s21, 3  ;;  %s316_s30 = scalar_lea.sflag (!%p1153_p8), [#allocation5], %s1284_s21 }
  0x64   : > { %s319_s8 = scalar_lea.vmem (!%p1153_p8), [#allocation4], %s726_s17  ;;  %p1402_p7 = scmp.ne.s32.totalorder (!%p1153_p8), %s1395_s11, 0 }
  0x69   : > { %1015 = dma.done.wait (%p1402_p7), %s316_s30, 128  }
  0x6a   : > { %1017 = vsyncadd (%p1402_p7), %s316_s30, 4294967168  ;;  %p1403_p2 = scmp.ne.s32.totalorder %s1393_s9, 0 }
  0x6c   : > { %1019 = dma.done.wait (%p1403_p2), [#allocation8], 1024  }
  0x6d   : > { %1021 = vsyncadd (%p1403_p2), [#allocation8], 4294966272  ;;  %vm370_vm0 = vcmask 261120   ;;  %v1298_v0 = vld [vmem:[%s319_s8] sm:$0xff]  ;;  %v404_v7 = vld [vmem:[#allocation7] sm:$0xff]  ;;  %v1055_v10 = vmov 0.0|0.0  }
  0x6e   : > { %v371_v1 = vsel %vm370_vm0, %v1298_v0, 0.0  ;;  %v405_v8 = vld [vmem:[#allocation7 + $0x8] sm:$0xff]  ;;  %772 = vmatprep.subr.bf16.mxu0 %v1055_v10  ;;  %v406_v11 = vld [vmem:[#allocation7 + $0x10] sm:$0xff]  ;;  %v407_v12 = vld [vmem:[#allocation7 + $0x18] sm:$0xff]  ;;  %778 = vmatprep.subr.bf16.mxu1 %v1055_v10  ;;  %v1056_v14 = vmov 0.0   ;;  %vm1057_vm1 = vmmov 0  }
  0x6f   : > { %372 = vadd.xlane.f32.xlu0 %v371_v1  ;;  %v773_v9 = vpack.c.bf16 %v405_v8, %v404_v7  ;;  %v776_v13 = vpack.c.bf16 %v407_v12, %v406_v11  ;;  %402 = vst.msk [vmem:[#allocation3] sm:$0xff] %vm370_vm0, %v1056_v14  ;;  %758 = vmatprep.mubr.msk.f32.mxu0 %vm1057_vm1, %v1056_v14  ;;  %v730_v19 = vld [vmem:[%s1379_s1] ss:$0 sm:$0xff]  ;;  %v496_v26 = vld [vmem:[#allocation9 + $0x8] sm:$0xff]  ;;  %v497_v28 = vld [vmem:[#allocation9 + $0x10] sm:$0xff]  ;;  %s737_s10 = sshll.u32 %s1040_s27, 7 }
  0x70   : > { %769 = vmatprep.mubr.msk.f32.mxu1 %vm1057_vm1, %v1056_v14  ;;  %v731_v21 = vld [vmem:[%s1380_s2] ss:$0 sm:$0xff]  ;;  %v498_v29 = vld [vmem:[#allocation9 + $0x18] sm:$0xff]  ;;  %s360_s22 = scalar_lea.vmem [#allocation10], %s726_s17  ;;  %s1328_s9 = scalar_lea.hbm %s1385_s7, %s737_s10 }
  0x71   : > { %774 = vmatpush3.bf16.msra.mxu0 %v773_v9  ;;  %v495_v25 = vld [vmem:[#allocation9] sm:$0xff]  ;;  %v782_v30 = vpack.c.bf16 %v498_v29, %v497_v28  ;;  %s603_s18 = sshll.u32 %s360_s22, 4  ;;  %s590_s11 = scalar_lea.sflag [#allocation6], %s1284_s21  ;;  %s1330_s18 = int_to_ptr.vmem [resolvable:$true] %s603_s18 }
  0x72   : > { %775 = vmatprep.subr.bf16.mxu0 %v1055_v10  ;;  %v779_v27 = vpack.c.bf16 %v496_v26, %v495_v25  ;;  %v732_v31 = vld [vmem:[%s1382_s4] ss:$0 sm:$0xff]  ;;  %s962_s27 = scalar_lea.vmem %s1330_s18, 128  ;;  %p1404_p12 = scmp.ne.s32.totalorder %s1400_s16, 0 }
  0x73   : > { %v735_v44 = vld [vmem:[%s1384_s6] ss:$0 sm:$0xff]  ;;  %p963_p8 = scmp.ne.s32.totalorder %s1330_s18, %s962_s27  ;;  %s1058_s17 = smov [#allocation10]  }
  0x74   : > { %780 = vmatpush3.bf16.msra.mxu1 %v779_v27  ;;  %s966_s13 = sshll.u32 %s1058_s17, 4  ;;  %s967_s13 = int_to_ptr.vmem [resolvable:$false] %s966_s13 }
  0x75   : > { %777 = vmatpush3.bf16.msra.mxu0 %v776_v13  ;;  %781 = vmatprep.subr.bf16.mxu1 %v1055_v10  ;;  %p964_p1 = pnand %p963_p8, %p1404_p12  ;;  %s968_s14 = scalar_lea.vmem %s967_s13, 256 }
  0x76   : > { %v494_v40 = vld [vmem:[#allocation3] sm:$0xff]  ;;  %p969_p3 = scmp.lt.s32.totalorder %s1330_s18, %s967_s13  ;;  %p970_p5 = scmp.lt.s32.totalorder %s968_s14, %s962_s27 }
  0x77   : > { %p965_p10 = pneg %p964_p1 }
  0x78   : > { %783 = vmatpush3.bf16.msra.mxu1 %v782_v30  ;;  %p971_p9 = por %p970_p5, %p969_p3 }
  0x7a   : > { %p972_p11 = pnand %p971_p9, %p965_p10 }
  0xfc   : > { %v373_v2 = vpop.xlane.xlu0 %372 }
  0xfd   : > { %v375_v3 = vmul.f32 0.03125, %v373_v2 }
  0xff   : > { %v376_v4 = vsub.f32 %v1298_v0, %v375_v3 }
 0x101   : > { %v377_v5 = vmul.f32 %v376_v4, %v376_v4 }
 0x103   : > { %v378_v6 = vsel %vm370_vm0, %v377_v5, 0.0 }
 0x104   : > { %379 = vadd.xlane.f32.xlu0 %v378_v6 }
 0x191   : > { %v380_v15 = vpop.xlane.xlu0 %379 }
 0x192   : > { %v381_v16 = vmul.f32 0.03125, %v380_v15 }
 0x194   : > { %v382_v17 = vadd.f32 1e-05, %v381_v16 }
 0x196   : > { %872 = vrsqrt.f32 %v382_v17 }
 0x1a0   : > { %v873_v18 = vpop.eup %872 }
 0x1a1   : > { %v384_v20 = vmul.f32 %v873_v18, %v376_v4 }
 0x1a3   : > { %v392_v22 = vmul.f32 %v730_v19, %v384_v20 }
 0x1a5   : > { %v400_v23 = vadd.f32 %v731_v21, %v392_v22 }
 0x1a7   : > { %401 = vst.msk [vmem:[#allocation2] sm:$0xff] %vm370_vm0, %v400_v23 }
 0x1ae   : > { %v403_v24 = vld [vmem:[#allocation2] sm:$0xff] }
 0x1af   : > { %759 = vmatmul.mubr.msk.f32.vlgmr.msra.gmra.mrb[0].mxu0 %vm370_vm0, %v403_v24 }
 0x282   : > { %v485_v32 = vpop.f32.mrb[0].mxu0 }
 0x283   : > { %v486_v33 = vadd.f32 %v732_v31, %v485_v32  ;;  %v760_v34 = vpop.f32.mrb[1].mxu0 }
 0x285   : > { %v490_v35 = vmul.f32 0.70710677, %v486_v33  ;;  %v489_v37 = vmul.f32 0.5, %v486_v33 }
 0x287   : > { %874 = verf.f32 %v490_v35 }
 0x291   : > { %v875_v36 = vpop.eup %874 }
 0x292   : > { %v492_v38 = vadd.f32 1.0, %v875_v36 }
 0x294   : > { %v493_v39 = vmul.f32 %v492_v38, %v489_v37 }
 0x296   : > { %770 = vmatmul.mubr.msk.f32.vlgmr.msra.gmra.mrb[0].mxu1 %vm370_vm0, %v493_v39 }
 0x369   : > { %v568_v41 = vpop.f32.mrb[0].mxu1 }
 0x36a   : > { %v572_v42 = vadd.f32 %v568_v41, %v494_v40  ;;  %v771_v43 = vpop.f32.mrb[1].mxu1 }
 0x36c   : > { %573 = vst.msk [vmem:[#allocation3] sm:$0xff] %vm370_vm0, %v572_v42 }
 0x373   : > { %v577_v45 = vld [vmem:[#allocation3] sm:$0xff] }
 0x374   : > { %v585_v46 = vadd.f32 %v735_v44, %v577_v45 }
 0x376   : > { %v587_v47 = vadd.f32 %v585_v46, %v1298_v0 }
 0x378   : > { %588 = vst.msk [vmem:[%s360_s22] sm:$0xff] %vm370_vm0, %v587_v47 }
 0x379   : > { %975 = shalt.err (!%p972_p11)
}
 0x37a   : > { %s976_s21 = scalar_lea.hbm %s1328_s9, 128  ;;  %s980_s12 = scalar_lea.hbm %s1385_s7, 256 }
 0x37b   : > { %p977_p0 = scmp.ne.s32.totalorder %s1328_s9, %s976_s21  ;;  %p981_p6 = scmp.lt.u32.totalorder %s1328_s9, %s1385_s7 }
 0x37c   : > { %p982_p7 = scmp.lt.u32.totalorder %s980_s12, %s976_s21  ;;  %p984_p8 = scmp.lt.u32.totalorder %s976_s21, %s1328_s9 }
 0x37d   : > { %p978_p4 = pnand %p977_p0, %p1404_p12 }
 0x37e   : > { %p983_p2 = por %p982_p7, %p981_p6 }
 0x37f   : > { %p979_p13 = pneg %p978_p4 }
 0x380   : > { %p985_p1 = por %p984_p8, %p983_p2 }
 0x382   : > { %p986_p10 = pnand %p985_p1, %p979_p13 }
 0x384   : > { %989 = shalt.err (!%p986_p10)
}
 0x385   : > { %794 = dma.vmem_to_hbm [thread:$0]  (%p1404_p12), %s1330_s18, 128, %s1328_s9, %s590_s11  }
 0x386 PF: > { %s1405_s22 = sld [smem:[#allocation14_spill]]  ;;  %s1406_s30 = sld [smem:[#allocation15_spill]] }
 0x387   : > { %p1408_p5 = scmp.ge.s32.totalorder %s1048_s29, 2 }
 0x38c   : > { %s615_s8 = sand.u32 1, %s1405_s22   ;;  %p1407_p3 = scmp.ne.s32.totalorder %s1406_s30, 0 }
 0x38d   : > { %s616_s27 = scalar_lea.sflag [#allocation6], %s615_s8 }
 0x38e   : > { %p808_p9 = pnand %p1408_p5, %p1407_p3 }
 0x390   : > { %1023 = dma.done.wait (!%p808_p9), %s616_s27, 128  }
 0x391   : > { %1025 = vsyncadd (!%p808_p9), %s616_s27, 4294967168  ;;  %s24_s29 = sadd.s32 1, %s1048_s29   ;;  %s1409_s24 = smov %s1032_s25 }
 0x392   : > { %p21_p11 = scmp.ge.s32.totalorder %s24_s29, 4   ;;  %s1410_s25 = smov %s1036_s26 }
 0x393   : > { %s1411_s26 = smov %s1241_s19  ;;  %s1412_s27 = smov %s1044_s28 }
 0x394   : > { %s1413_s28 = smov %s1415_s20  ;;  %23 = sbr.rel (!%p21_p11) target bundleno = 7 (0x7), region = 114 }
 0x39b   :  { %621 = vsyncpa [#allocation5], 1 }
 0x39c   :  { %623 = vsyncpa [#allocation5 + $0x1], 1 }
 0x39d   :  { %624 = vsyncpa [#allocation8], 1 }
 0x39e   :  { %625 = vsyncpa [#allocation6], 1 }
 0x39f   :  { %627 = vsyncpa [#allocation6 + $0x1], 1 }

</bundles_post_ra>
